<compile_context>
chip_gen: v6e
topology: v6e:2x2x1
jax: 0.10.0
libtpu: 0.0.40
codegen_flags: <defaults>
</compile_context>

<pallas_src>
import jax
import jax.numpy as jnp
from jax.experimental import pallas as pl
from jax.experimental.pallas import tpu as pltpu


def center_loss(x, centers, labels):
    """x: (B, D), centers: (C, D), labels: (B,) int -> scalar f32 loss."""
    B, D = x.shape
    C, Dc = centers.shape
    assert D == Dc

    labels_i32 = labels.astype(jnp.int32)

    # Insert a singleton axis so the per-row blocking happens on a *leading*
    # axis and the trailing two block dims always equal the full array dims
    # (keeps the (8,128) block-shape rule trivially satisfied for any B/C/D).
    x3 = x.reshape(B, 1, D)
    c3 = centers.reshape(C, 1, D)

    # Analytic contribution of the B*(C-1) masked-out entries (clamp floor).
    extra = float(B * (C - 1)) * 1e-12

    def kernel(labels_ref, x_ref, c_ref, o_ref, acc_ref):
        i = pl.program_id(0)

        @pl.when(i == 0)
        def _init():
            acc_ref[...] = jnp.zeros_like(acc_ref)

        xv = x_ref[...].astype(jnp.float32)   # (1, 1, D): feature row i
        cv = c_ref[...].astype(jnp.float32)   # (1, 1, D): centers[labels[i]]

        # Same norm-expansion form as the reference distmat entry (VPU only;
        # a contraction depth of D=2 would leave the MXU ~100% idle).
        xx = jnp.sum(xv * xv, axis=-1, keepdims=True)   # (1, 1, 1)
        cc = jnp.sum(cv * cv, axis=-1, keepdims=True)
        xc = jnp.sum(xv * cv, axis=-1, keepdims=True)
        d = jnp.clip(xx + cc - 2.0 * xc, 1e-12, 1e12)

        acc_ref[...] += d

        @pl.when(i == pl.num_programs(0) - 1)
        def _finalize():
            o_ref[...] = (acc_ref[...] + extra) / float(B) / float(D)

    grid_spec = pltpu.PrefetchScalarGridSpec(
        num_scalar_prefetch=1,            # labels -> SMEM, drives the gather
        grid=(B,),                        # one feature row per grid step
        in_specs=[
            # x row i
            pl.BlockSpec((1, 1, D), lambda i, lbl: (i, 0, 0)),
            # centers row labels[i]: block size 1 => block index == row index
            pl.BlockSpec((1, 1, D), lambda i, lbl: (lbl[i], 0, 0)),
        ],
        out_specs=pl.BlockSpec((1, 1, 1), lambda i, lbl: (0, 0, 0)),
        scratch_shapes=[pltpu.VMEM((1, 1, 1), jnp.float32)],
    )

    out = pl.pallas_call(
        kernel,
        out_shape=jax.ShapeDtypeStruct((1, 1, 1), jnp.float32),
        grid_spec=grid_spec,
        compiler_params=pltpu.CompilerParams(
            # Single reduction axis: accumulator/output stay resident across it.
            dimension_semantics=("arbitrary",),
        ),
    )(labels_i32, x3, c3)
    return out[0, 0, 0]


def center_loss_ref(x, centers, labels):
    """Pure-JAX reference mirroring the PyTorch forward exactly."""
    B, D = x.shape
    C = centers.shape[0]
    distmat = (
        jnp.sum(x * x, axis=1, keepdims=True)
        + jnp.sum(centers * centers, axis=1, keepdims=True).T
        - 2.0 * x @ centers.T
    )
    mask = (labels[:, None] == jnp.arange(C)[None, :]).astype(jnp.float32)
    dist = jnp.clip(distmat * mask, 1e-12, 1e12)
    return jnp.sum(dist) / B / D


if __name__ == "__main__":
    # Module defaults: num_classes=10, feat_dim=2; small batch of 8.
    num_classes, feat_dim, batch = 10, 2, 8

    key = jax.random.PRNGKey(0)
    kx, kc, kl = jax.random.split(key, 3)

    x = jax.random.normal(kx, (batch, feat_dim), dtype=jnp.float32)
    # Deterministic in-script init of the learnable centers (torch.randn analog).
    centers = jax.random.normal(kc, (num_classes, feat_dim), dtype=jnp.float32)
    labels = jax.random.randint(kl, (batch,), 0, num_classes, dtype=jnp.int32)

    loss = center_loss(x, centers, labels)
    jax.block_until_ready(loss)

    ref = center_loss_ref(x, centers, labels)
    assert jnp.allclose(loss, ref, rtol=1e-5, atol=1e-6), (loss, ref)

    print("KERNEL_OK")
</pallas_src>

<mosaic_0001>
module attributes {stable_mosaic.version = 11 : i64} {
  func.func @kernel(%arg0: i32, %arg1: memref<8xi32, #tpu.memory_space<smem>>, %arg2: memref<1x1x2xf32, #tpu.memory_space<vmem>>, %arg3: memref<1x1x2xf32, #tpu.memory_space<vmem>>, %arg4: memref<1x1x1xf32, #tpu.memory_space<vmem>>, %arg5: memref<1x1x1xf32, #tpu.memory_space<vmem>>) attributes {dimension_semantics = [#tpu.dimension_semantics<arbitrary>], iteration_bounds = array<i64: 8>, scalar_prefetch = 1 : i64, scratch_operands = 1 : i64, tpu.core_type = #tpu.core_type<tc>, window_params = [{transform_indices = @transform_0, window_bounds = array<i64: 1, 1, 2>}, {transform_indices = @transform_1, window_bounds = array<i64: 1, 1, 2>}, {pipeline_mode = #tpu.pipeline_mode<synchronous>, transform_indices = @transform_2, window_bounds = array<i64: 1, 1, 1>}]} {
    %c0_i32 = arith.constant 0 : i32
    %0 = arith.cmpi eq, %arg0, %c0_i32 : i32
    %1 = arith.extui %0 : i1 to i32
    %c0_i32_0 = arith.constant 0 : i32
    %2 = arith.cmpi ne, %1, %c0_i32_0 : i32
    scf.if %2 {
      %cst_18 = arith.constant 0.000000e+00 : f32
      %28 = vector.broadcast %cst_18 : f32 to vector<1x1x1xf32>
      %c0_19 = arith.constant 0 : index
      %c0_20 = arith.constant 0 : index
      %c0_21 = arith.constant 0 : index
      %29 = vector.load %arg5[%c0_19, %c0_20, %c0_21] : memref<1x1x1xf32, #tpu.memory_space<vmem>>, vector<1x1x1xf32>
      tpu.vector_store %arg5[%c0_19, %c0_20, %c0_21], %28 {strides = array<i32>} : memref<1x1x1xf32, #tpu.memory_space<vmem>>, vector<1x1x1xf32>,
    } else {
    }
    %c0 = arith.constant 0 : index
    %c0_1 = arith.constant 0 : index
    %c0_2 = arith.constant 0 : index
    %3 = vector.load %arg2[%c0, %c0_1, %c0_2] : memref<1x1x2xf32, #tpu.memory_space<vmem>>, vector<1x1x2xf32>
    %c0_3 = arith.constant 0 : index
    %c0_4 = arith.constant 0 : index
    %c0_5 = arith.constant 0 : index
    %4 = vector.load %arg3[%c0_3, %c0_4, %c0_5] : memref<1x1x2xf32, #tpu.memory_space<vmem>>, vector<1x1x2xf32>
    %5 = arith.mulf %3, %3 : vector<1x1x2xf32>
    %cst = arith.constant dense<0.000000e+00> : vector<1x1xf32>
    %6 = vector.multi_reduction <add>, %5, %cst [2] : vector<1x1x2xf32> to vector<1x1xf32>
    %7 = vector.shape_cast %6 : vector<1x1xf32> to vector<1x1x1xf32>
    %8 = arith.mulf %4, %4 : vector<1x1x2xf32>
    %cst_6 = arith.constant dense<0.000000e+00> : vector<1x1xf32>
    %9 = vector.multi_reduction <add>, %8, %cst_6 [2] : vector<1x1x2xf32> to vector<1x1xf32>
    %10 = vector.shape_cast %9 : vector<1x1xf32> to vector<1x1x1xf32>
    %11 = arith.mulf %3, %4 : vector<1x1x2xf32>
    %cst_7 = arith.constant dense<0.000000e+00> : vector<1x1xf32>
    %12 = vector.multi_reduction <add>, %11, %cst_7 [2] : vector<1x1x2xf32> to vector<1x1xf32>
    %13 = vector.shape_cast %12 : vector<1x1xf32> to vector<1x1x1xf32>
    %14 = arith.addf %7, %10 : vector<1x1x1xf32>
    %cst_8 = arith.constant 2.000000e+00 : f32
    %15 = vector.broadcast %cst_8 : f32 to vector<1x1x1xf32>
    %16 = arith.mulf %15, %13 : vector<1x1x1xf32>
    %17 = arith.subf %14, %16 : vector<1x1x1xf32>
    %cst_9 = arith.constant 9.99999996E-13 : f32
    %cst_10 = arith.constant 9.99999995E+11 : f32
    %18 = vector.broadcast %cst_9 : f32 to vector<1x1x1xf32>
    %19 = arith.maximumf %18, %17 : vector<1x1x1xf32>
    %20 = vector.broadcast %cst_10 : f32 to vector<1x1x1xf32>
    %21 = arith.minimumf %20, %19 : vector<1x1x1xf32>
    %c0_11 = arith.constant 0 : index
    %c0_12 = arith.constant 0 : index
    %c0_13 = arith.constant 0 : index
    %22 = vector.load %arg5[%c0_11, %c0_12, %c0_13] : memref<1x1x1xf32, #tpu.memory_space<vmem>>, vector<1x1x1xf32>
    %23 = arith.addf %22, %21 : vector<1x1x1xf32>
    %c0_14 = arith.constant 0 : index
    %c0_15 = arith.constant 0 : index
    %c0_16 = arith.constant 0 : index
    %24 = vector.load %arg5[%c0_14, %c0_15, %c0_16] : memref<1x1x1xf32, #tpu.memory_space<vmem>>, vector<1x1x1xf32>
    tpu.vector_store %arg5[%c0_14, %c0_15, %c0_16], %23 {strides = array<i32>} : memref<1x1x1xf32, #tpu.memory_space<vmem>>, vector<1x1x1xf32>,
    %c7_i32 = arith.constant 7 : i32
    %25 = arith.cmpi eq, %arg0, %c7_i32 : i32
    %26 = arith.extui %25 : i1 to i32
    %c0_i32_17 = arith.constant 0 : i32
    %27 = arith.cmpi ne, %26, %c0_i32_17 : i32
    scf.if %27 {
      %c0_18 = arith.constant 0 : index
      %c0_19 = arith.constant 0 : index
      %c0_20 = arith.constant 0 : index
      %28 = vector.load %arg5[%c0_18, %c0_19, %c0_20] : memref<1x1x1xf32, #tpu.memory_space<vmem>>, vector<1x1x1xf32>
      %cst_21 = arith.constant 7.200000e-11 : f32
      %29 = vector.broadcast %cst_21 : f32 to vector<1x1x1xf32>
      %30 = arith.addf %28, %29 : vector<1x1x1xf32>
      %cst_22 = arith.constant 8.000000e+00 : f32
      %31 = vector.broadcast %cst_22 : f32 to vector<1x1x1xf32>
      %32 = arith.divf %30, %31 : vector<1x1x1xf32>
      %cst_23 = arith.constant 2.000000e+00 : f32
      %33 = vector.broadcast %cst_23 : f32 to vector<1x1x1xf32>
      %34 = arith.divf %32, %33 : vector<1x1x1xf32>
      %c0_24 = arith.constant 0 : index
      %c0_25 = arith.constant 0 : index
      %c0_26 = arith.constant 0 : index
      %35 = vector.load %arg4[%c0_24, %c0_25, %c0_26] : memref<1x1x1xf32, #tpu.memory_space<vmem>>, vector<1x1x1xf32>
      tpu.vector_store %arg4[%c0_24, %c0_25, %c0_26], %34 {strides = array<i32>} : memref<1x1x1xf32, #tpu.memory_space<vmem>>, vector<1x1x1xf32>,
    } else {
    }
    return
  }
  func.func @transform_0(%arg0: i32, %arg1: memref<8xi32, #tpu.memory_space<smem>>) -> (i32, i32, i32) {
    %c0_i32 = arith.constant 0 : i32
    %c0_i32_0 = arith.constant 0 : i32
    %c0_i32_1 = arith.constant 0 : i32
    return %arg0, %c0_i32, %c0_i32_0 : i32, i32, i32
  }
  func.func @transform_1(%arg0: i32, %arg1: memref<8xi32, #tpu.memory_space<smem>>) -> (i32, i32, i32) {
    %0 = arith.index_cast %arg0 : i32 to index
    %1 = memref.load %arg1[%0] : memref<8xi32, #tpu.memory_space<smem>>
    %c0_i32 = arith.constant 0 : i32
    %c0_i32_0 = arith.constant 0 : i32
    %c0_i32_1 = arith.constant 0 : i32
    return %1, %c0_i32, %c0_i32_0 : i32, i32, i32
  }
  func.func @transform_2(%arg0: i32, %arg1: memref<8xi32, #tpu.memory_space<smem>>) -> (i32, i32, i32) {
    %c0_i32 = arith.constant 0 : i32
    %c0_i32_0 = arith.constant 0 : i32
    %c0_i32_1 = arith.constant 0 : i32
    %c0_i32_2 = arith.constant 0 : i32
    return %c0_i32, %c0_i32_0, %c0_i32_1 : i32, i32, i32
  }
}

</mosaic_0001>

<bundles_post_ra>
// kernel: tpu_custom_call.1
= control target key start
LH: loop header
LB: loop body
LE: loop exit
PB: predicated region body
PF: predicated region fallthrough
CT: control target
= control target key end

     0   :  { %s384_s0 = inlined_call_operand.vmem [shape: s32[8], index: 0, kind: input, shape index: {}]   ;;  %s385_s1 = inlined_call_operand.vmem [shape: f32[8,1,2], index: 1, kind: input, shape index: {}]   ;;  %s386_s2 = inlined_call_operand.vmem [shape: f32[10,1,2], index: 2, kind: input, shape index: {}]   ;;  %s387_s3 = inlined_call_operand.hbm [shape: f32[1,1,1], index: 3, kind: output, shape index: {}]  }
   0x1   :  { %s8_s14 = sshll.u32 %s384_s0, 4  ;;  %s9_s14 = int_to_ptr.vmem [resolvable:$true] %s8_s14 }
   0x2   :  { %s272_s15 = scalar_lea.vmem %s9_s14, 16  ;;  %p277_p1 = scmp.lt.s32.totalorder %s9_s14, %s9_s14 }
   0x3   :  { %p273_p0 = scmp.ne.s32.totalorder %s9_s14, %s272_s15  ;;  %p278_p2 = scmp.lt.s32.totalorder %s272_s15, %s272_s15 }
   0x5   :  { %p279_p3 = por %p278_p2, %p277_p1 }
   0x7   :  { %p280_p4 = pnand %p279_p3, %p273_p0 }
   0x9   :  { %283 = shalt.err (!%p280_p4)  }
   0xa   :  { %s322_s16 = smov [#allocation4]  }
   0xb   :  { %11 = dma.vmem_to_smem %s9_s14, 16, %s322_s16, [#allocation3] }
   0xc   :  { %312 = dma.done.wait [#allocation3], 16 }
   0xd   :  { %313 = vsyncadd [#allocation3], 4294967280 }
   0xe   :  { %13 = sfence }
   0xf   :  { %14 = vsyncpa [#allocation6], 0  ;;  %s348_s17 = smov 0  }
  0x10 LB: > { %s354_s0 = sadd.s32 4294967295, %s320_s17   ;;  %p248_p5 = scmp.ge.s32.totalorder %s320_s17, 1  ;;  %s320_s17 = sphi %s348_s17, %s20_s17  }
  0x11   : > { %p125_p6 = scmp.lt.s32.totalorder %s320_s17, 9 }
  0x13   : > { %p126_p7 = pnand %p248_p5, %p125_p6 }
  0x14   : > { %p144_p8 = scmp.lt.s32.totalorder (!%p126_p7), %s354_s0, 7  ;;  %s147_s18 = sld [smem:[#allocation4 + %s354_s0]] (!%p126_p7) }
  0x15   : > { %129 = sbr.rel (%p126_p7) target bundleno = 220 (0xdc), region = 28  ;;  %p249_p10 = scmp.ne.s32.totalorder (!%p126_p7), %s354_s0, 0 }
  0x1a   : > { %s145_s19 = scalar_select %p144_p8, %s354_s0, 7 }
  0x1b   : > { %p148_p9 = scmp.lt.s32.totalorder %s147_s18, 9  ;;  %155 = sbr.rel (%p249_p10) target bundleno = 34 (0x22), region = 32 }
  0x1c   : > { %s146_s22 = scalar_lea.vmem %s385_s1, %s145_s19 }
  0x1d   : > { %s389_s18 = smov (!%p148_p9, %s147_s18), 9 }
  0x1e   : > { %s150_s25 = scalar_lea.vmem %s386_s2, %s389_s18 }
  0x20   : > { %vm156_vm0 = vcmask 0   ;;  %v323_v0 = vmov 0.0  }
  0x21   : > { %157 = vst.msk [vmem:[#allocation2] sm:$0x1] %vm156_vm0, %v323_v0 }
  0x22 PF: > { %v158_v1 = vld [vmem:[%s146_s22] sm:$0x1]  ;;  %vm161_vm1 = vcmask 8192   ;;  %vm180_vm2 = vcmask 0   ;;  %p250_p11 = scmp.ne.s32.totalorder %s354_s0, 7 }
  0x23   : > { %v159_v2 = vld [vmem:[%s150_s25] sm:$0x1]  ;;  %v160_v3 = vmul.f32 %v158_v1, %v158_v1 }
  0x24   : > { %v169_v4 = vmul.f32 %v159_v2, %v158_v1  ;;  %v165_v5 = vmul.f32 %v159_v2, %v159_v2 }
  0x25   : > { %v162_v6 = vsel %vm161_vm1, %v160_v3, 0.0 }
  0x26   : > { %v170_v7 = vsel %vm161_vm1, %v169_v4, 0.0  ;;  %163 = vadd.xlane.f32.xlu0 %v162_v6  ;;  %v166_v8 = vsel %vm161_vm1, %v165_v5, 0.0 }
  0x27   : > { %171 = vadd.xlane.f32.xlu1 %v170_v7 }
  0x28   : > { %v178_v16 = vld [vmem:[#allocation2] sm:$0x1] }
  0x2a   : > { %167 = vadd.xlane.f32.xlu0 %v166_v8 }
  0xaf   : > { %v164_v9 = vpop.xlane.xlu0 %163 }
  0xb0   : > { %v172_v10 = vpop.xlane.xlu1 %171 }
  0xb1   : > { %v174_v11 = vmul.f32 2.0, %v172_v10 }
  0xb3   : > { %v168_v12 = vpop.xlane.xlu0 %167 }
  0xb4   : > { %v173_v13 = vadd.f32 %v168_v12, %v164_v9 }
  0xb6   : > { %v175_v14 = vsub.f32 %v173_v13, %v174_v11 }
  0xb8   : > { %v176_v15 = vmax.f32 %v175_v14, 1e-12 }
  0xba   : > { %v177_v17 = vmin.f32 %v176_v15, 1e+12  ;;  %185 = sbr.rel (%p250_p11) target bundleno = 205 (0xcd), region = 36 }
  0xbc   : > { %v179_v18 = vadd.f32 %v178_v16, %v177_v17 }
  0xbe   : > { %181 = vst.msk [vmem:[#allocation2] sm:$0x1] %vm180_vm2, %v179_v18 }
  0xc5   : > { %v186_v19 = vld [vmem:[#allocation2] sm:$0x1] }
  0xc6   : > { %v187_v20 = vadd.f32 7.2e-11, %v186_v19 }
  0xc8   : > { %v189_v21 = vmul.f32 0.125, %v187_v20 }
  0xca   : > { %v191_v22 = vmul.f32 0.5, %v189_v21 }
  0xcc   : > { %192 = vst.msk [vmem:[#allocation5] sm:$0x1] %vm180_vm2, %v191_v22 }
  0xcd PF: > { %p259_p12 = scmp.eq.s32.totalorder %s354_s0, 7  ;;  %s324_s26 = smov [#allocation5]  }
  0xce   : > { %s200_s27 = sshll.u32 %s324_s26, 4  ;;  %s201_s27 = int_to_ptr.vmem [resolvable:$true] %s200_s27 }
  0xcf   : > { %s284_s28 = scalar_lea.vmem %s201_s27, 16  ;;  %s290_s29 = scalar_lea.vmem %s201_s27, 32 }
  0xd0   : > { %p285_p13 = scmp.ne.s32.totalorder %s201_s27, %s284_s28  ;;  %p291_p2 = scmp.lt.s32.totalorder %s201_s27, %s201_s27 }
  0xd1   : > { %p292_p3 = scmp.lt.s32.totalorder %s290_s29, %s284_s28 }
  0xd2   : > { %p286_p0 = pnand %p285_p13, %p259_p12 }
  0xd3   : > { %p293_p4 = por %p292_p3, %p291_p2 }
  0xd4   : > { %p287_p1 = pneg %p286_p0 }
  0xd6   : > { %p294_p5 = pnand %p293_p4, %p287_p1 }
  0xd8   : > { %297 = shalt.err (!%p294_p5)
}
  0xd9   : > { %256 = dma.vmem_to_hbm [thread:$0]  (%p259_p12), %s201_s27, 16, %s387_s3, [#allocation6]  }
  0xda   : > { %315 = dma.done.wait (%p259_p12), [#allocation6], 16  }
  0xdb   : > { %317 = vsyncadd (%p259_p12), [#allocation6], 4294967280 }
  0xdc PF: > { %s20_s17 = sadd.s32 1, %s320_s17  }
  0xdd   : > { %p17_p6 = scmp.ge.s32.totalorder %s20_s17, 10  }
  0xdf   :  { %19 = sbr.rel (!%p17_p6) target bundleno = 16 (0x10), region = 66 }
  0xe4   :  { %213 = vsyncpa [#allocation6], 1 }
  0xe5   :  { %215 = vsyncpa [#allocation6 + $0x1], 1 }

</bundles_post_ra>
